<compile_context>
chip_gen: v6e
topology: v6e:2x2x1
jax: 0.10.0
libtpu: 0.0.40
codegen_flags: <defaults>
</compile_context>

<pallas_src>
import math

import jax
import jax.numpy as jnp
from jax.experimental import pallas as pl
from jax.experimental.pallas import tpu as pltpu


def _round_up(x, m):
    return ((x + m - 1) // m) * m


def _pick_tile(total, cap):
    """Largest multiple-of-128 divisor of `total` (a 128-multiple) that is <= cap."""
    k = total // 128
    tmax = max(1, min(cap // 128, k))
    for t in range(tmax, 0, -1):
        if k % t == 0:
            return 128 * t
    return 128


def _vmem_limit(need_bytes):
    # Computed from actual block sizes + headroom; 48 MiB cap is safe on
    # v5e/v6e (128 MiB physical VMEM) and v7x (64 MiB).
    return int(min(max(need_bytes + 16 * 1024 * 1024, 32 * 1024 * 1024),
                   48 * 1024 * 1024))


# ---------------------------------------------------------------------------
# Conv2d: tap-accumulation kernel over a flat, phase-decomposed padded input
# ---------------------------------------------------------------------------
def _make_conv_tap_kernel(taps, tm, n_m):
    """taps: list of (phase_index, flat_offset); one small MXU matmul per tap."""

    def kernel(w_ref, b_ref, x_ref, o_ref):
        # w_ref: (n_taps, Cout_p, Cin) bf16    b_ref: (Cout_p, 1) f32
        # x_ref: (n_phases, Cin, Lsub_p) bf16  (whole padded input, this batch)
        # o_ref: (Cout_p, TM)                  (lane-dense flat pixel tile)
        cout_p = w_ref.shape[1]
        acc = jnp.zeros((cout_p, tm), jnp.float32)
        if n_m == 1:
            for t, (ph, off) in enumerate(taps):
                xs = x_ref[ph, :, off:off + tm]                    # static slice
                acc = acc + jnp.dot(w_ref[t], xs,
                                    preferred_element_type=jnp.float32)
        else:
            base = pl.multiple_of(pl.program_id(1) * tm, 128)
            for t, (ph, off) in enumerate(taps):
                xs = x_ref[ph, :, pl.ds(base + off, tm)]
                acc = acc + jnp.dot(w_ref[t], xs,
                                    preferred_element_type=jnp.float32)
        o_ref[...] = (acc + b_ref[...]).astype(o_ref.dtype)

    return kernel


def prepare_conv_input(x, padding, stride):
    """Pad x spatially, phase-decompose for the stride, flatten row-major and
    zero-pad the flat axis.  Shared by the base conv and all scale convs."""
    B, Cin, H, W = x.shape
    s = int(stride)
    xp = jnp.pad(x, ((0, 0), (0, 0), (padding, padding), (padding, padding)))
    Hp, Wp = H + 2 * padding, W + 2 * padding
    Hsub, Wsub = -(-Hp // s), -(-Wp // s)
    phases = []
    for ph in range(s):
        for pw in range(s):
            sub = xp[:, :, ph::s, pw::s]
            sub = jnp.pad(sub, ((0, 0), (0, 0),
                                (0, Hsub - sub.shape[2]),
                                (0, Wsub - sub.shape[3])))
            phases.append(sub)
    xsub = jnp.stack(phases, axis=1)                   # (B, s*s, Cin, Hsub, Wsub)
    Lsub = Hsub * Wsub
    Lsub_p = _round_up(Lsub, 128) + 128                # rounding + tap-halo guard
    xflat = xsub.reshape(B, s * s, Cin, Lsub)
    xflat = jnp.pad(xflat, ((0, 0), (0, 0), (0, 0), (0, Lsub_p - Lsub)))
    return xflat.astype(jnp.bfloat16), Hp, Wp, Hsub, Wsub


def conv2d_pallas(xflat, weight, bias, stride, Hp, Wp, Hsub, Wsub, *,
                  out_dtype=jnp.float32, tm_cap=2048):
    """Returns (out_flat:(B, Cout_p, Np), Ho, Wo, row_width=Wsub, Cout_p).
    out_flat[b, co, ho*Wsub + wo] is the conv result for wo < Wo; columns in
    [Wo, Wsub) and the flat tail beyond Ho*Wsub are junk and must be sliced."""
    B, n_phases, Cin, Lsub_p = xflat.shape
    Cout, _, kh, kw = weight.shape
    s = int(stride)
    Ho = (Hp - kh) // s + 1
    Wo = (Wp - kw) // s + 1
    if Ho < 1 or Wo < 1:
        raise ValueError("kernel larger than padded input")
    Cout_p = _round_up(Cout, 8)

    taps = [((ih % s) * s + (iw % s), (ih // s) * Wsub + (iw // s))
            for ih in range(kh) for iw in range(kw)]
    n_taps = kh * kw

    w_t = jnp.transpose(weight, (2, 3, 0, 1)).reshape(n_taps, Cout, Cin)
    b1 = bias
    if Cout_p != Cout:
        w_t = jnp.pad(w_t, ((0, 0), (0, Cout_p - Cout), (0, 0)))
        b1 = jnp.pad(b1, (0, Cout_p - Cout))
    w_t = w_t.astype(jnp.bfloat16)                    # bf16 MXU inputs, f32 accum
    b2 = b1.reshape(Cout_p, 1).astype(jnp.float32)

    Np = _round_up(Ho * Wsub, 128)                    # decoupled from TM
    TM = _pick_tile(Np, tm_cap)
    n_m = Np // TM

    out_isz = jnp.dtype(out_dtype).itemsize
    need = (2 * (n_phases * Cin * Lsub_p * 2 + Cout_p * TM * out_isz)
            + n_taps * Cout_p * Cin * 2 + Cout_p * 4)

    out = pl.pallas_call(
        _make_conv_tap_kernel(taps, TM, n_m),
        out_shape=jax.ShapeDtypeStruct((B, Cout_p, Np), out_dtype),
        grid=(B, n_m),
        in_specs=[
            pl.BlockSpec((n_taps, Cout_p, Cin), lambda b, m: (0, 0, 0)),   # weights
            pl.BlockSpec((Cout_p, 1), lambda b, m: (0, 0)),                # bias
            pl.BlockSpec((None, n_phases, Cin, Lsub_p),
                         lambda b, m: (b, 0, 0, 0)),                       # flat input
        ],
        out_specs=pl.BlockSpec((None, Cout_p, TM), lambda b, m: (b, 0, m)),
        compiler_params=pltpu.CompilerParams(
            dimension_semantics=("parallel", "arbitrary"),
            vmem_limit_bytes=_vmem_limit(need)),
    )(w_t, b2, xflat)
    return out, Ho, Wo, Wsub, Cout_p


# ---------------------------------------------------------------------------
# PyTorch-style bilinear interpolation (align_corners=False) as dense matrices
# ---------------------------------------------------------------------------
def _pt_bilinear_matrix(in_size, out_size, scale_factor=None):
    """R:(out_size, in_size) such that out = R @ in reproduces
    F.interpolate(mode='bilinear', align_corners=False) along one axis."""
    if scale_factor is not None and scale_factor > 0:
        ratio = 1.0 / float(scale_factor)      # PyTorch scale_factor semantics
    else:
        ratio = in_size / out_size             # size-based semantics
    j = jnp.arange(out_size, dtype=jnp.int32)
    src = jnp.maximum((j.astype(jnp.float32) + 0.5) * ratio - 0.5, 0.0)
    i0 = jnp.minimum(jnp.floor(src).astype(jnp.int32), in_size - 1)
    i1 = jnp.minimum(i0 + 1, in_size - 1)
    l1 = src - i0.astype(jnp.float32)
    l0 = 1.0 - l1
    R = jnp.zeros((out_size, in_size), jnp.float32)
    R = R.at[j, i0].add(l0)
    R = R.at[j, i1].add(l1)
    return R


def _scale_pair(s):
    if isinstance(s, (tuple, list)):
        return float(s[0]), float(s[1])
    return float(s), float(s)


# ---------------------------------------------------------------------------
# Fused (separable bilinear resize + multiscale max) Pallas kernel
# ---------------------------------------------------------------------------
def _make_fused_resize_max_kernel(n_scales, tcc, w0):
    def kernel(*refs):
        # refs = (f0, [fs_i, Rh_i, RwT_i]*n_scales, out)
        f0_ref, o_ref = refs[0], refs[-1]
        mats = [(refs[1 + 3 * i], refs[2 + 3 * i][...], refs[3 + 3 * i][...])
                for i in range(n_scales)]
        for c in range(tcc):
            acc = f0_ref[c, :, :w0]                              # (H0, W0) f32
            for fs_ref, rh, rwT in mats:
                t = jnp.dot(rh, fs_ref[c],
                            preferred_element_type=jnp.float32)  # (H0, RWs)
                r = jnp.dot(t.astype(jnp.bfloat16), rwT,
                            preferred_element_type=jnp.float32)  # (H0, W0)
                acc = jnp.maximum(acc, r)
            o_ref[c] = acc
    return kernel


def fused_resize_max_pallas(f0_2d, fs_list, rh_list, rw_list, W0):
    """f0_2d:(B,Cout_p,H0,RW0) f32; fs_list[i]:(B,Cout_p,Hs,RWs) bf16;
    rh_list[i]:(H0,Hs) bf16; rw_list[i]:(RWs,W0) bf16 (zero rows on junk cols).
    Returns (B, Cout_p, H0, W0) f32 elementwise max over base + resized maps."""
    B, Cout_p, H0, RW0 = f0_2d.shape
    TCC = 8                                   # Cout_p is always a multiple of 8
    n_cb = Cout_p // TCC

    args = [f0_2d]
    in_specs = [pl.BlockSpec((None, TCC, H0, RW0), lambda b, c: (b, c, 0, 0))]
    need = 2 * TCC * H0 * (RW0 + W0) * 4
    for f, rh, rwT in zip(fs_list, rh_list, rw_list):
        Hs, RWs = f.shape[2], f.shape[3]
        args += [f, rh, rwT]
        in_specs += [
            pl.BlockSpec((None, TCC, Hs, RWs), lambda b, c: (b, c, 0, 0)),
            pl.BlockSpec((H0, Hs), lambda b, c: (0, 0)),
            pl.BlockSpec((RWs, W0), lambda b, c: (0, 0)),
        ]
        need += 2 * (TCC * Hs * RWs + H0 * Hs + RWs * W0) * 2

    return pl.pallas_call(
        _make_fused_resize_max_kernel(len(fs_list), TCC, W0),
        out_shape=jax.ShapeDtypeStruct((B, Cout_p, H0, W0), jnp.float32),
        grid=(B, n_cb),
        in_specs=in_specs,
        out_specs=pl.BlockSpec((None, TCC, H0, W0), lambda b, c: (b, c, 0, 0)),
        compiler_params=pltpu.CompilerParams(
            dimension_semantics=("parallel", "parallel"),
            vmem_limit_bytes=_vmem_limit(need)),
    )(*args)


# ---------------------------------------------------------------------------
# MultiscaleConv2d forward
# ---------------------------------------------------------------------------
def multiscale_conv2d_forward(x, weight, bias, *, stride=1, padding=0,
                              scale_factors=(1.0,),
                              output_type='pooled_map',
                              training_mode='train_and_eval',
                              training_state=False):
    B, Cin, H, W = x.shape
    Cout, _, kh, kw = weight.shape

    # flat / phase-decomposed padded input, shared by base + scale convs
    xflat, Hp, Wp, Hsub, Wsub = prepare_conv_input(x, padding, stride)

    f0_flat, H0, W0, RW0, Cout_p = conv2d_pallas(
        xflat, weight, bias, stride, Hp, Wp, Hsub, Wsub, out_dtype=jnp.float32)
    f0_2d = f0_flat[:, :, :H0 * RW0].reshape(B, Cout_p, H0, RW0)
    f_map0 = f0_2d[:, :Cout, :, :W0]

    if len(scale_factors) == 0:
        pool_matrix = f_map0
    else:
        fs_list, rh_list, rw_list = [], [], []
        for s in scale_factors:
            sh, sw = _scale_pair(s)
            okh = int(math.floor(kh * sh))
            okw = int(math.floor(kw * sw))
            if okh < 1 or okw < 1:
                raise ValueError(f"scale factor {s} shrinks the kernel to zero size")
            # bilinear resize of the base conv weights (scale_factor semantics)
            Rh_k = _pt_bilinear_matrix(kh, okh, scale_factor=sh)    # (okh, kh)
            Rw_k = _pt_bilinear_matrix(kw, okw, scale_factor=sw)    # (okw, kw)
            w_s = jnp.einsum('Hh,ochw,Ww->ocHW', Rh_k, weight, Rw_k)

            f_s_flat, Hs, Ws, RWs, _ = conv2d_pallas(
                xflat, w_s, bias, stride, Hp, Wp, Hsub, Wsub,
                out_dtype=jnp.bfloat16)          # bf16 scale maps: half the HBM
            fs_list.append(f_s_flat[:, :, :Hs * RWs].reshape(B, Cout_p, Hs, RWs))

            # separable size-based bilinear resize back to (H0, W0)
            rh_list.append(_pt_bilinear_matrix(Hs, H0).astype(jnp.bfloat16))
            Rw = _pt_bilinear_matrix(Ws, W0)                        # (W0, Ws)
            rwT = jnp.zeros((RWs, W0), jnp.float32).at[:Ws, :].set(Rw.T)
            rw_list.append(rwT.astype(jnp.bfloat16))

        fused = fused_resize_max_pallas(f0_2d, fs_list, rh_list, rw_list, W0)
        pool_matrix = fused[:, :Cout]

    if output_type == 'pooled_map':
        output_matrix = pool_matrix
    else:
        raise NotImplementedError("only output_type='pooled_map' implemented")

    if training_mode == 'train_and_eval':
        return output_matrix
    if training_mode == 'only_eval':
        return f_map0 if training_state else output_matrix
    if training_mode == 'only_train':
        return output_matrix if training_state else f_map0
    raise NotImplementedError(training_mode)


# ---------------------------------------------------------------------------
if __name__ == "__main__":
    key = jax.random.PRNGKey(0)
    k1, k2, k3 = jax.random.split(key, 3)

    B, Cin, H, W = 2, 4, 16, 16
    Cout, kernel_size = 8, (3, 3)
    padding, stride = 1, 1
    scale_factors = [1.5, 0.7]

    x = jax.random.normal(k1, (B, Cin, H, W), dtype=jnp.float32)
    weight = 0.1 * jax.random.normal(k2, (Cout, Cin) + kernel_size, dtype=jnp.float32)
    bias = 0.1 * jax.random.normal(k3, (Cout,), dtype=jnp.float32)

    out = multiscale_conv2d_forward(
        x, weight, bias, stride=stride, padding=padding,
        scale_factors=scale_factors, output_type='pooled_map',
        training_mode='train_and_eval', training_state=True)
    out = jax.block_until_ready(out)

    assert out.shape == (B, Cout, H, W), out.shape
    assert out.dtype == jnp.float32
    print("KERNEL_OK")
</pallas_src>

<mosaic_0001>
module attributes {stable_mosaic.version = 11 : i64} {
  func.func @kernel(%arg0: i32, %arg1: i32, %arg2: memref<9x8x4xbf16, #tpu.memory_space<vmem>>, %arg3: memref<8x1xf32, #tpu.memory_space<vmem>>, %arg4: memref<1x1x4x512xbf16, #tpu.memory_space<vmem>>, %arg5: memref<1x8x384xf32, #tpu.memory_space<vmem>>) attributes {dimension_semantics = [#tpu.dimension_semantics<parallel>, #tpu.dimension_semantics<arbitrary>], iteration_bounds = array<i64: 2, 1>, scalar_prefetch = 0 : i64, scratch_operands = 0 : i64, tpu.core_type = #tpu.core_type<tc>, window_params = [{pipeline_mode = #tpu.pipeline_mode<synchronous>, transform_indices = @transform_0, window_bounds = array<i64: 9, 8, 4>}, {pipeline_mode = #tpu.pipeline_mode<synchronous>, transform_indices = @transform_1, window_bounds = array<i64: 8, 1>}, {transform_indices = @transform_2, window_bounds = array<i64: 1, 1, 4, 512>}, {transform_indices = @transform_3, window_bounds = array<i64: 1, 8, 384>}]} {
    %cst = arith.constant 0.000000e+00 : f32
    %0 = vector.broadcast %cst : f32 to vector<8x384xf32>
    %c0 = arith.constant 0 : index
    %c0_0 = arith.constant 0 : index
    %c0_1 = arith.constant 0 : index
    %c0_2 = arith.constant 0 : index
    %1 = vector.load %arg4[%c0, %c0_0, %c0_1, %c0_2] : memref<1x1x4x512xbf16, #tpu.memory_space<vmem>>, vector<1x1x4x384xbf16>
    %2 = vector.shape_cast %1 : vector<1x1x4x384xbf16> to vector<4x384xbf16>
    %c0_3 = arith.constant 0 : index
    %c0_4 = arith.constant 0 : index
    %c0_5 = arith.constant 0 : index
    %3 = vector.load %arg2[%c0_3, %c0_4, %c0_5] : memref<9x8x4xbf16, #tpu.memory_space<vmem>>, vector<1x8x4xbf16>
    %4 = vector.shape_cast %3 : vector<1x8x4xbf16> to vector<8x4xbf16>
    %cst_6 = arith.constant dense<0.000000e+00> : vector<8x384xf32>
    %5 = tpu.matmul %4, %2, %cst_6 {dimension_numbers = #tpu.dot_dimension_numbers<[1], [0], [0], [1], [0, 0, 1, 1], [], []>} : vector<8x4xbf16>, vector<4x384xbf16>, vector<8x384xf32> -> vector<8x384xf32>
    %6 = arith.addf %0, %5 : vector<8x384xf32>
    %c0_7 = arith.constant 0 : index
    %c0_8 = arith.constant 0 : index
    %c0_9 = arith.constant 0 : index
    %c1 = arith.constant 1 : index
    %7 = vector.load %arg4[%c0_7, %c0_8, %c0_9, %c1] : memref<1x1x4x512xbf16, #tpu.memory_space<vmem>>, vector<1x1x4x384xbf16>
    %8 = vector.shape_cast %7 : vector<1x1x4x384xbf16> to vector<4x384xbf16>
    %c1_10 = arith.constant 1 : index
    %c0_11 = arith.constant 0 : index
    %c0_12 = arith.constant 0 : index
    %9 = vector.load %arg2[%c1_10, %c0_11, %c0_12] : memref<9x8x4xbf16, #tpu.memory_space<vmem>>, vector<1x8x4xbf16>
    %10 = vector.shape_cast %9 : vector<1x8x4xbf16> to vector<8x4xbf16>
    %cst_13 = arith.constant dense<0.000000e+00> : vector<8x384xf32>
    %11 = tpu.matmul %10, %8, %cst_13 {dimension_numbers = #tpu.dot_dimension_numbers<[1], [0], [0], [1], [0, 0, 1, 1], [], []>} : vector<8x4xbf16>, vector<4x384xbf16>, vector<8x384xf32> -> vector<8x384xf32>
    %12 = arith.addf %6, %11 : vector<8x384xf32>
    %c0_14 = arith.constant 0 : index
    %c0_15 = arith.constant 0 : index
    %c0_16 = arith.constant 0 : index
    %c2 = arith.constant 2 : index
    %13 = vector.load %arg4[%c0_14, %c0_15, %c0_16, %c2] : memref<1x1x4x512xbf16, #tpu.memory_space<vmem>>, vector<1x1x4x384xbf16>
    %14 = vector.shape_cast %13 : vector<1x1x4x384xbf16> to vector<4x384xbf16>
    %c2_17 = arith.constant 2 : index
    %c0_18 = arith.constant 0 : index
    %c0_19 = arith.constant 0 : index
    %15 = vector.load %arg2[%c2_17, %c0_18, %c0_19] : memref<9x8x4xbf16, #tpu.memory_space<vmem>>, vector<1x8x4xbf16>
    %16 = vector.shape_cast %15 : vector<1x8x4xbf16> to vector<8x4xbf16>
    %cst_20 = arith.constant dense<0.000000e+00> : vector<8x384xf32>
    %17 = tpu.matmul %16, %14, %cst_20 {dimension_numbers = #tpu.dot_dimension_numbers<[1], [0], [0], [1], [0, 0, 1, 1], [], []>} : vector<8x4xbf16>, vector<4x384xbf16>, vector<8x384xf32> -> vector<8x384xf32>
    %18 = arith.addf %12, %17 : vector<8x384xf32>
    %c0_21 = arith.constant 0 : index
    %c0_22 = arith.constant 0 : index
    %c0_23 = arith.constant 0 : index
    %c18 = arith.constant 18 : index
    %19 = vector.load %arg4[%c0_21, %c0_22, %c0_23, %c18] : memref<1x1x4x512xbf16, #tpu.memory_space<vmem>>, vector<1x1x4x384xbf16>
    %20 = vector.shape_cast %19 : vector<1x1x4x384xbf16> to vector<4x384xbf16>
    %c3 = arith.constant 3 : index
    %c0_24 = arith.constant 0 : index
    %c0_25 = arith.constant 0 : index
    %21 = vector.load %arg2[%c3, %c0_24, %c0_25] : memref<9x8x4xbf16, #tpu.memory_space<vmem>>, vector<1x8x4xbf16>
    %22 = vector.shape_cast %21 : vector<1x8x4xbf16> to vector<8x4xbf16>
    %cst_26 = arith.constant dense<0.000000e+00> : vector<8x384xf32>
    %23 = tpu.matmul %22, %20, %cst_26 {dimension_numbers = #tpu.dot_dimension_numbers<[1], [0], [0], [1], [0, 0, 1, 1], [], []>} : vector<8x4xbf16>, vector<4x384xbf16>, vector<8x384xf32> -> vector<8x384xf32>
    %24 = arith.addf %18, %23 : vector<8x384xf32>
    %c0_27 = arith.constant 0 : index
    %c0_28 = arith.constant 0 : index
    %c0_29 = arith.constant 0 : index
    %c19 = arith.constant 19 : index
    %25 = vector.load %arg4[%c0_27, %c0_28, %c0_29, %c19] : memref<1x1x4x512xbf16, #tpu.memory_space<vmem>>, vector<1x1x4x384xbf16>
    %26 = vector.shape_cast %25 : vector<1x1x4x384xbf16> to vector<4x384xbf16>
    %c4 = arith.constant 4 : index
    %c0_30 = arith.constant 0 : index
    %c0_31 = arith.constant 0 : index
    %27 = vector.load %arg2[%c4, %c0_30, %c0_31] : memref<9x8x4xbf16, #tpu.memory_space<vmem>>, vector<1x8x4xbf16>
    %28 = vector.shape_cast %27 : vector<1x8x4xbf16> to vector<8x4xbf16>
    %cst_32 = arith.constant dense<0.000000e+00> : vector<8x384xf32>
    %29 = tpu.matmul %28, %26, %cst_32 {dimension_numbers = #tpu.dot_dimension_numbers<[1], [0], [0], [1], [0, 0, 1, 1], [], []>} : vector<8x4xbf16>, vector<4x384xbf16>, vector<8x384xf32> -> vector<8x384xf32>
    %30 = arith.addf %24, %29 : vector<8x384xf32>
    %c0_33 = arith.constant 0 : index
    %c0_34 = arith.constant 0 : index
    %c0_35 = arith.constant 0 : index
    %c20 = arith.constant 20 : index
    %31 = vector.load %arg4[%c0_33, %c0_34, %c0_35, %c20] : memref<1x1x4x512xbf16, #tpu.memory_space<vmem>>, vector<1x1x4x384xbf16>
    %32 = vector.shape_cast %31 : vector<1x1x4x384xbf16> to vector<4x384xbf16>
    %c5 = arith.constant 5 : index
    %c0_36 = arith.constant 0 : index
    %c0_37 = arith.constant 0 : index
    %33 = vector.load %arg2[%c5, %c0_36, %c0_37] : memref<9x8x4xbf16, #tpu.memory_space<vmem>>, vector<1x8x4xbf16>
    %34 = vector.shape_cast %33 : vector<1x8x4xbf16> to vector<8x4xbf16>
    %cst_38 = arith.constant dense<0.000000e+00> : vector<8x384xf32>
    %35 = tpu.matmul %34, %32, %cst_38 {dimension_numbers = #tpu.dot_dimension_numbers<[1], [0], [0], [1], [0, 0, 1, 1], [], []>} : vector<8x4xbf16>, vector<4x384xbf16>, vector<8x384xf32> -> vector<8x384xf32>
    %36 = arith.addf %30, %35 : vector<8x384xf32>
    %c0_39 = arith.constant 0 : index
    %c0_40 = arith.constant 0 : index
    %c0_41 = arith.constant 0 : index
    %c36 = arith.constant 36 : index
    %37 = vector.load %arg4[%c0_39, %c0_40, %c0_41, %c36] : memref<1x1x4x512xbf16, #tpu.memory_space<vmem>>, vector<1x1x4x384xbf16>
    %38 = vector.shape_cast %37 : vector<1x1x4x384xbf16> to vector<4x384xbf16>
    %c6 = arith.constant 6 : index
    %c0_42 = arith.constant 0 : index
    %c0_43 = arith.constant 0 : index
    %39 = vector.load %arg2[%c6, %c0_42, %c0_43] : memref<9x8x4xbf16, #tpu.memory_space<vmem>>, vector<1x8x4xbf16>
    %40 = vector.shape_cast %39 : vector<1x8x4xbf16> to vector<8x4xbf16>
    %cst_44 = arith.constant dense<0.000000e+00> : vector<8x384xf32>
    %41 = tpu.matmul %40, %38, %cst_44 {dimension_numbers = #tpu.dot_dimension_numbers<[1], [0], [0], [1], [0, 0, 1, 1], [], []>} : vector<8x4xbf16>, vector<4x384xbf16>, vector<8x384xf32> -> vector<8x384xf32>
    %42 = arith.addf %36, %41 : vector<8x384xf32>
    %c0_45 = arith.constant 0 : index
    %c0_46 = arith.constant 0 : index
    %c0_47 = arith.constant 0 : index
    %c37 = arith.constant 37 : index
    %43 = vector.load %arg4[%c0_45, %c0_46, %c0_47, %c37] : memref<1x1x4x512xbf16, #tpu.memory_space<vmem>>, vector<1x1x4x384xbf16>
    %44 = vector.shape_cast %43 : vector<1x1x4x384xbf16> to vector<4x384xbf16>
    %c7 = arith.constant 7 : index
    %c0_48 = arith.constant 0 : index
    %c0_49 = arith.constant 0 : index
    %45 = vector.load %arg2[%c7, %c0_48, %c0_49] : memref<9x8x4xbf16, #tpu.memory_space<vmem>>, vector<1x8x4xbf16>
    %46 = vector.shape_cast %45 : vector<1x8x4xbf16> to vector<8x4xbf16>
    %cst_50 = arith.constant dense<0.000000e+00> : vector<8x384xf32>
    %47 = tpu.matmul %46, %44, %cst_50 {dimension_numbers = #tpu.dot_dimension_numbers<[1], [0], [0], [1], [0, 0, 1, 1], [], []>} : vector<8x4xbf16>, vector<4x384xbf16>, vector<8x384xf32> -> vector<8x384xf32>
    %48 = arith.addf %42, %47 : vector<8x384xf32>
    %c0_51 = arith.constant 0 : index
    %c0_52 = arith.constant 0 : index
    %c0_53 = arith.constant 0 : index
    %c38 = arith.constant 38 : index
    %49 = vector.load %arg4[%c0_51, %c0_52, %c0_53, %c38] : memref<1x1x4x512xbf16, #tpu.memory_space<vmem>>, vector<1x1x4x384xbf16>
    %50 = vector.shape_cast %49 : vector<1x1x4x384xbf16> to vector<4x384xbf16>
    %c8 = arith.constant 8 : index
    %c0_54 = arith.constant 0 : index
    %c0_55 = arith.constant 0 : index
    %51 = vector.load %arg2[%c8, %c0_54, %c0_55] : memref<9x8x4xbf16, #tpu.memory_space<vmem>>, vector<1x8x4xbf16>
    %52 = vector.shape_cast %51 : vector<1x8x4xbf16> to vector<8x4xbf16>
    %cst_56 = arith.constant dense<0.000000e+00> : vector<8x384xf32>
    %53 = tpu.matmul %52, %50, %cst_56 {dimension_numbers = #tpu.dot_dimension_numbers<[1], [0], [0], [1], [0, 0, 1, 1], [], []>} : vector<8x4xbf16>, vector<4x384xbf16>, vector<8x384xf32> -> vector<8x384xf32>
    %54 = arith.addf %48, %53 : vector<8x384xf32>
    %c0_57 = arith.constant 0 : index
    %c0_58 = arith.constant 0 : index
    %55 = vector.load %arg3[%c0_57, %c0_58] : memref<8x1xf32, #tpu.memory_space<vmem>>, vector<8x1xf32>
    %56 = vector.broadcast %55 : vector<8x1xf32> to vector<8x384xf32>
    %57 = arith.addf %54, %56 : vector<8x384xf32>
    %c0_59 = arith.constant 0 : index
    %c0_60 = arith.constant 0 : index
    %c0_61 = arith.constant 0 : index
    %58 = vector.load %arg5[%c0_59, %c0_60, %c0_61] : memref<1x8x384xf32, #tpu.memory_space<vmem>>, vector<1x8x384xf32>
    %59 = vector.shape_cast %58 : vector<1x8x384xf32> to vector<8x384xf32>
    %60 = vector.shape_cast %57 : vector<8x384xf32> to vector<1x8x384xf32>
    tpu.vector_store %arg5[%c0_59, %c0_60, %c0_61], %60 {strides = array<i32>} : memref<1x8x384xf32, #tpu.memory_space<vmem>>, vector<1x8x384xf32>,
    return
  }
  func.func @transform_0(%arg0: i32, %arg1: i32) -> (i32, i32, i32) {
    %c0_i32 = arith.constant 0 : i32
    %c0_i32_0 = arith.constant 0 : i32
    %c0_i32_1 = arith.constant 0 : i32
    %c0_i32_2 = arith.constant 0 : i32
    return %c0_i32, %c0_i32_0, %c0_i32_1 : i32, i32, i32
  }
  func.func @transform_1(%arg0: i32, %arg1: i32) -> (i32, i32) {
    %c0_i32 = arith.constant 0 : i32
    %c0_i32_0 = arith.constant 0 : i32
    %c0_i32_1 = arith.constant 0 : i32
    return %c0_i32, %c0_i32_0 : i32, i32
  }
  func.func @transform_2(%arg0: i32, %arg1: i32) -> (i32, i32, i32, i32) {
    %c0_i32 = arith.constant 0 : i32
    %c0_i32_0 = arith.constant 0 : i32
    %c0_i32_1 = arith.constant 0 : i32
    %c0_i32_2 = arith.constant 0 : i32
    return %arg0, %c0_i32, %c0_i32_0, %c0_i32_1 : i32, i32, i32, i32
  }
  func.func @transform_3(%arg0: i32, %arg1: i32) -> (i32, i32, i32) {
    %c0_i32 = arith.constant 0 : i32
    %c0_i32_0 = arith.constant 0 : i32
    return %arg0, %c0_i32, %arg1 : i32, i32, i32
  }
}

</mosaic_0001>

<bundles_post_ra>
// kernel: tpu_custom_call.1
= control target key start
LH: loop header
LB: loop body
LE: loop exit
PB: predicated region body
PF: predicated region fallthrough
CT: control target
= control target key end

     0   :  { %8 = vsyncpa [#allocation3], 0  ;;  %s1963_s0 = inlined_call_operand.vmem [shape: bf16[9,8,4], index: 0, kind: input, shape index: {}]   ;;  %s1964_s1 = inlined_call_operand.vmem [shape: f32[8,1], index: 1, kind: input, shape index: {}]   ;;  %s1965_s2 = inlined_call_operand.vmem [shape: bf16[2,1,4,512], index: 2, kind: input, shape index: {}]   ;;  %s1966_s3 = inlined_call_operand.hbm [shape: f32[2,8,384], index: 3, kind: output, shape index: {}]  }
   0x1   :  { %10 = vsyncpa [#allocation3 + $0x1], 0  ;;  %s1728_s12 = smov 0   ;;  %s1730_s13 = smov 0  }
   0x2   :  { %s1732_s14 = smov 0   ;;  %s1734_s15 = smov 0  }
   0x3   :  { %s1736_s16 = smov 0   ;;  %s1738_s17 = smov 0  }
   0x4 LB: > { %s1427_s18 = sadd.s32 4294967295, %s1693_s17   ;;  %s1428_s19 = sadd.s32 4294967294, %s1693_s17   ;;  %s1693_s17 = sphi %s1738_s17, %s16_s17   ;;  %s1689_s16 = sphi %s1736_s16, %s1973_s16   ;;  %s1685_s15 = sphi %s1734_s15, %s1972_s15   ;;  %s1681_s14 = sphi %s1732_s14, %s1971_s14   ;;  %s1677_s13 = sphi %s1730_s13, %s1970_s13   ;;  %s1673_s12 = sphi %s1728_s12, %s1969_s12  }
   0x5   : > { %s28_s20 = sadd.s32 1, %s1689_s16  ;;  %s105_s21 = sadd.s32 1, %s1681_s14 }
   0x6   : > { %p30_p0 = scmp.ge.s32.totalorder %s28_s20, 2  ;;  %p115_p1 = scmp.ne.s32.totalorder %s1681_s14, %s1677_s13 }
   0x7   : > { %p116_p2 = scmp.eq.s32.totalorder %s1427_s18, 1  ;;  %p121_p3 = scmp.ne.s32.totalorder %s1677_s13, %s1673_s12 }
   0x8   : > { %s1975_s20 = smov (%p30_p0, %s28_s20), 0  ;;  %p122_p5 = scmp.eq.s32.totalorder %s1428_s19, 1 }
   0x9   : > { %p1768_p4 = por %p116_p2, %p115_p1  ;;  %s100_s23 = ssub.s32 %s1689_s16, %s1975_s20 }
   0xa   : > { %p1431_p6 = scmp.ge.s32.totalorder %s1693_s17, 1  ;;  %p103_p7 = scmp.eq.s32.totalorder %s100_s23, 0 }
   0xb   : > { %p1775_p8 = por %p122_p5, %p121_p3  ;;  %p154_p9 = scmp.lt.s32.totalorder %s1693_s17, 3 }
   0xc   : > { %s1781_s25 = scalar_select %p103_p7, %s1681_s14, %s105_s21  }
   0xd   : > { %p155_p10 = pnand %p1431_p6, %p154_p9 }
   0xe   : > { %p178_p11 = scmp.lt.s32.totalorder (!%p155_p10), %s1685_s15, 1  ;;  %s1699_s4 = smov (!%p155_p10), 127  }
   0xf   : > { %158 = sbr.rel (%p155_p10) target bundleno = 429 (0x1ad), region = 32  ;;  %s1700_s5 = smov (!%p155_p10), 126  }
  0x10   : > { %s1701_s6 = smov (!%p155_p10), 110   ;;  %s1702_s7 = smov (!%p155_p10), 109  }
  0x11   : > { %s1703_s8 = smov (!%p155_p10), 108   ;;  %s1704_s9 = smov (!%p155_p10), 92  }
  0x12   : > { %s1705_s10 = smov (!%p155_p10), 91   ;;  %s1706_s11 = smov (!%p155_p10), 90  }
  0x13   : > { %s175_s23 = sand.u32 (!%p155_p10), 1, %s1677_s13  }
  0x14   : > { %v195_v0 = vlaneseq  ;;  %v1695_v1 = vmov 1983009808   ;;  %s179_s26 = scalar_select %p178_p11, %s1685_s15, 1  ;;  %v1696_v5 = vmov 0.0   ;;  %v1697_v6 = vmov 0   ;;  %v1328_v18 = vld [vmem:[%s1964_s1] sm:$0xff] }
  0x15   : > { %v193_v2 = vunpack.c.l.s4 %v1695_v1  ;;  %1491 = vmatprep.subr.bf16.mxu1 %v1696_v5  ;;  %266 = vmatprep.mubr.bf16.mxu0 %v1697_v6  ;;  %vm1698_vm0 = vmmov 0   ;;  %vm216_vm1 = vcmask 1039360   ;;  %vm224_vm2 = vcmask 1041408   ;;  %v1434_v28 = vld [vmem:[%s1963_s0 + $0x4] sm:$0xf] }
  0x16   : > { %v196_v3 = vshrl.u32 %v195_v0, 7  ;;  %s1472_s27 = sshll.u32 %s179_s26, 3  ;;  %1614 = vset.pattern.permute.xlu0 %v1697_v6  ;;  %1493 = vmatprep.mubr.msk.bf16.mxu1 %vm1698_vm0, %v1696_v5  ;;  %vm220_vm3 = vcmask 31744   ;;  %vm454_vm4 = vcmask 1031168   ;;  %v186_v39 = vld [vmem:[%s1963_s0] sm:$0xf] }
  0x17   : > { %v194_v4 = vunpack.c.0.s8 %v193_v2  ;;  %s182_s30 = scalar_lea.vmem %s1965_s2, %s1472_s27  ;;  %vm583_vm5 = vcmask 900096   ;;  %v1441_v49 = vld [vmem:[%s1963_s0 + $0x8] sm:$0xf]  ;;  %vm712_vm6 = vcmask 891904   ;;  %v1445_v59 = vld [vmem:[%s1963_s0 + $0xc] sm:$0xf] }
  0x18   : > { %v187_v8 = vld [vmem:[%s182_s30] sm:$0xff]  ;;  %vm841_vm7 = vcmask 883712   ;;  %vm970_vm8 = vcmask 752640   ;;  %vm1099_vm9 = vcmask 744448   ;;  %vm1228_vm10 = vcmask 736256   ;;  %s1545_s26 = smul.u32 24, %s175_s23 }
  0x19   : > { %v197_v7 = vsub.s32 %v194_v4, %v196_v3  ;;  %v185_v9 = vld [vmem:[%s182_s30] sm:$0x3f]  ;;  %v191_v11 = vcombine.high %v187_v8, %v187_v8  ;;  %s1546_s27 = smul.u32 384, %s1685_s15  ;;  %s1341_s15 = scalar_lea.sflag [#allocation3], %s175_s23 }
  0x1a   : > { %v316_v13 = vcombine.high %v185_v9, %v185_v9  ;;  %s177_s28 = scalar_lea.vmem [#allocation2], %s1545_s26 }
  0x1b   : > { %v198_v10 = vrot.slane %v187_v8, %v197_v7  ;;  %v1793_v12 = vrot.slane %v185_v9, %v197_v7  ;;  %v205_v15 = vrot.slane %v191_v11, %v197_v7  ;;  %s1357_s29 = sshll.u32 %s177_s28, 4  ;;  %s1917_s29 = int_to_ptr.vmem [resolvable:$true] %s1357_s29 }
  0x1c   : > { %v1795_v16 = vrot.slane %v316_v13, %v197_v7  ;;  %v1449_v7 = vld [vmem:[%s1963_s0 + $0x10] sm:$0xf] }
  0x1d   : > { %208 = vrot.lane.b32.xlu0 %v198_v10, %s1699_s4  ;;  %v206_v14 = vcombine.high %v198_v10, %v198_v10  ;;  %212 = vrot.lane.b32.xlu1 %v205_v15, %s1699_s4  ;;  %v207_v17 = vcombine.high %v205_v15, %v205_v15  ;;  %v331_v22 = vcombine.high %v1793_v12, %v1793_v12  ;;  %v336_v31 = vsel %vm224_vm2, %v1793_v12, 0 }
  0x1e   : > { %v342_v33 = vsel %vm224_vm2, %v1795_v16, 0 }
  0x21   : > { %210 = vrot.lane.b32.xlu0 %v206_v14, %s1699_s4  ;;  %214 = vrot.lane.b32.xlu1 %v207_v17, %s1699_s4 }
  0x25   : > { %446 = vrot.lane.b32.xlu0 %v198_v10, %s1700_s5  ;;  %448 = vrot.lane.b32.xlu1 %v206_v14, %s1700_s5 }
  0x29   : > { %450 = vrot.lane.b32.xlu0 %v205_v15, %s1700_s5  ;;  %452 = vrot.lane.b32.xlu1 %v207_v17, %s1700_s5  ;;  %s1915_s5 = scalar_lea.hbm %s1966_s3, %s1546_s27 }
  0x2d   : > { %575 = vrot.lane.b32.xlu0 %v198_v10, %s1701_s6  ;;  %577 = vrot.lane.b32.xlu1 %v206_v14, %s1701_s6 }
  0x31   : > { %579 = vrot.lane.b32.xlu0 %v205_v15, %s1701_s6  ;;  %581 = vrot.lane.b32.xlu1 %v207_v17, %s1701_s6  ;;  %s1617_s6 = scalar_lea.vmem %s1917_s29, 384 }
  0x32   : > { %p1618_p12 = scmp.ne.s32.totalorder %s1917_s29, %s1617_s6 }
  0x34   : > { %p1619_p13 = pnand %p1618_p12, %p1768_p4 }
  0x35   : > { %704 = vrot.lane.b32.xlu0 %v198_v10, %s1702_s7  ;;  %706 = vrot.lane.b32.xlu1 %v206_v14, %s1702_s7 }
  0x36   : > { %p1620_p0 = pneg %p1619_p13 }
  0x39   : > { %708 = vrot.lane.b32.xlu0 %v205_v15, %s1702_s7  ;;  %710 = vrot.lane.b32.xlu1 %v207_v17, %s1702_s7  ;;  %s1707_s7 = smov [#allocation2]  }
  0x3d   : > { %833 = vrot.lane.b32.xlu0 %v198_v10, %s1703_s8  ;;  %835 = vrot.lane.b32.xlu1 %v206_v14, %s1703_s8 }
  0x41   : > { %837 = vrot.lane.b32.xlu0 %v205_v15, %s1703_s8  ;;  %839 = vrot.lane.b32.xlu1 %v207_v17, %s1703_s8  ;;  %s1621_s8 = sshll.u32 %s1707_s7, 4  ;;  %s1622_s8 = int_to_ptr.vmem [resolvable:$false] %s1621_s8 }
  0x42   : > { %p1624_p1 = scmp.lt.s32.totalorder %s1917_s29, %s1622_s8 }
  0x45   : > { %962 = vrot.lane.b32.xlu0 %v198_v10, %s1704_s9  ;;  %964 = vrot.lane.b32.xlu1 %v206_v14, %s1704_s9 }
  0x49   : > { %966 = vrot.lane.b32.xlu0 %v205_v15, %s1704_s9  ;;  %968 = vrot.lane.b32.xlu1 %v207_v17, %s1704_s9  ;;  %s1623_s9 = scalar_lea.vmem %s1622_s8, 768 }
  0x4a   : > { %p1625_p2 = scmp.lt.s32.totalorder %s1623_s9, %s1617_s6 }
  0x4c   : > { %p1626_p3 = por %p1625_p2, %p1624_p1 }
  0x4d   : > { %1091 = vrot.lane.b32.xlu0 %v198_v10, %s1705_s10  ;;  %1093 = vrot.lane.b32.xlu1 %v206_v14, %s1705_s10 }
  0x4e   : > { %p1627_p5 = pnand %p1626_p3, %p1620_p0 }
  0x51   : > { %1095 = vrot.lane.b32.xlu0 %v205_v15, %s1705_s10  ;;  %1097 = vrot.lane.b32.xlu1 %v207_v17, %s1705_s10 }
  0x55   : > { %1220 = vrot.lane.b32.xlu0 %v198_v10, %s1706_s11  ;;  %1222 = vrot.lane.b32.xlu1 %v206_v14, %s1706_s11 }
  0x59   : > { %1224 = vrot.lane.b32.xlu0 %v205_v15, %s1706_s11  ;;  %1226 = vrot.lane.b32.xlu1 %v207_v17, %s1706_s11  ;;  %v1453_v17 = vld [vmem:[%s1963_s0 + $0x14] sm:$0xf] }
  0x5d   : > { %1331 = vperm.xlu0 %1614, %v1328_v18  }
  0x8f   : > { %v209_v19 = vpop.permute.xlu0 %208  ;;  %v213_v20 = vpop.permute.xlu1 %212 }
  0x93   : > { %v211_v21 = vpop.permute.xlu0 %210  ;;  %v215_v25 = vpop.permute.xlu1 %214 }
  0x94   : > { %v218_v23 = vsel %vm216_vm1, %v211_v21, %v213_v20  ;;  %v217_v24 = vsel %vm216_vm1, %v209_v19, %v211_v21  ;;  %v219_v27 = vsel %vm216_vm1, %v213_v20, %v215_v25 }
  0x95   : > { %1435 = vmatprep.subr.msk.bf16.mxu0 %vm224_vm2, %v218_v23  ;;  %v226_v26 = vsel %vm224_vm2, %v217_v24, 0  ;;  %v232_v29 = vsel %vm224_vm2, %v219_v27, 0  ;;  %v1457_v27 = vld [vmem:[%s1963_s0 + $0x18] sm:$0xf] }
  0x96   : > { %249 = vmatpush1.bf16.msra.mxu0 %v226_v26  ;;  %1492 = vmatpush3.bf16.msra.mxu1 %v232_v29 }
  0x97   : > { %v447_v30 = vpop.permute.xlu0 %446  ;;  %1438 = vmatprep.subr.msk.bf16.mxu0 %vm224_vm2, %v331_v22  ;;  %1497 = vmatprep.subr.bf16.mxu1 %v1696_v5  ;;  %v449_v32 = vpop.permute.xlu1 %448 }
  0x98   : > { %v455_v35 = vsel %vm454_vm4, %v447_v30, %v449_v32 }
  0x99   : > { %1436 = vmatmul.mubr.msk.bf16.vlgmr.msra.gmra.mxu0 %vm220_vm3, %v1434_v28  ;;  %1494 = vmatmul.mubr.msk.bf16.vlgmr.msra.gmra.mxu1 %vm220_vm3, %v1434_v28  ;;  %v462_v40 = vsel %vm224_vm2, %v455_v35, 0 }
  0x9a   : > { %359 = vmatpush1.bf16.msra.mxu0 %v336_v31  ;;  %376 = vmatprep.mubr.bf16.mxu0 %v1697_v6 }
  0x9b   : > { %v451_v34 = vpop.permute.xlu0 %450  ;;  %1498 = vmatpush3.bf16.msra.mxu1 %v342_v33  ;;  %1499 = vmatprep.mubr.msk.bf16.mxu1 %vm1698_vm0, %v1696_v5  ;;  %v453_v37 = vpop.permute.xlu1 %452 }
  0x9c   : > { %v456_v36 = vsel %vm454_vm4, %v449_v32, %v451_v34  ;;  %1503 = vmatprep.subr.bf16.mxu1 %v1696_v5  ;;  %v457_v38 = vsel %vm454_vm4, %v451_v34, %v453_v37  ;;  %v1461_v37 = vld [vmem:[%s1963_s0 + $0x1c] sm:$0xf] }
  0x9d   : > { %1442 = vmatprep.subr.msk.bf16.mxu0 %vm224_vm2, %v456_v36  ;;  %v468_v42 = vsel %vm224_vm2, %v457_v38, 0 }
  0x9f   : > { %v576_v41 = vpop.permute.xlu0 %575  ;;  %v578_v43 = vpop.permute.xlu1 %577 }
  0xa0   : > { %v584_v45 = vsel %vm583_vm5, %v576_v41, %v578_v43 }
  0xa1   : > { %1439 = vmatmul.mubr.msk.bf16.vlgmr.msra.gmra.mxu0 %vm220_vm3, %v186_v39  ;;  %1500 = vmatmul.mubr.msk.bf16.vlgmr.msra.gmra.mxu1 %vm220_vm3, %v186_v39  ;;  %v591_v50 = vsel %vm224_vm2, %v584_v45, 0 }
  0xa2   : > { %485 = vmatpush1.bf16.msra.mxu0 %v462_v40  ;;  %502 = vmatprep.mubr.bf16.mxu0 %v1697_v6  ;;  %v1465_v40 = vld [vmem:[%s1963_s0 + $0x20] sm:$0xf] }
  0xa3   : > { %v580_v44 = vpop.permute.xlu0 %579  ;;  %1504 = vmatpush3.bf16.msra.mxu1 %v468_v42  ;;  %1505 = vmatprep.mubr.msk.bf16.mxu1 %vm1698_vm0, %v1696_v5  ;;  %v582_v47 = vpop.permute.xlu1 %581 }
  0xa4   : > { %v585_v46 = vsel %vm583_vm5, %v578_v43, %v580_v44  ;;  %1509 = vmatprep.subr.bf16.mxu1 %v1696_v5  ;;  %v586_v48 = vsel %vm583_vm5, %v580_v44, %v582_v47 }
  0xa5   : > { %1446 = vmatprep.subr.msk.bf16.mxu0 %vm224_vm2, %v585_v46  ;;  %v597_v52 = vsel %vm224_vm2, %v586_v48, 0 }
  0xa7   : > { %v705_v51 = vpop.permute.xlu0 %704  ;;  %v707_v53 = vpop.permute.xlu1 %706 }
  0xa8   : > { %v713_v55 = vsel %vm712_vm6, %v705_v51, %v707_v53 }
  0xa9   : > { %1443 = vmatmul.mubr.msk.bf16.vlgmr.msra.gmra.mxu0 %vm220_vm3, %v1441_v49  ;;  %1506 = vmatmul.mubr.msk.bf16.vlgmr.msra.gmra.mxu1 %vm220_vm3, %v1441_v49  ;;  %v720_v60 = vsel %vm224_vm2, %v713_v55, 0 }
  0xaa   : > { %614 = vmatpush1.bf16.msra.mxu0 %v591_v50  ;;  %631 = vmatprep.mubr.bf16.mxu0 %v1697_v6 }
  0xab   : > { %v709_v54 = vpop.permute.xlu0 %708  ;;  %1510 = vmatpush3.bf16.msra.mxu1 %v597_v52  ;;  %1511 = vmatprep.mubr.msk.bf16.mxu1 %vm1698_vm0, %v1696_v5  ;;  %v711_v57 = vpop.permute.xlu1 %710 }
  0xac   : > { %v714_v56 = vsel %vm712_vm6, %v707_v53, %v709_v54  ;;  %1515 = vmatprep.subr.bf16.mxu1 %v1696_v5  ;;  %v715_v58 = vsel %vm712_vm6, %v709_v54, %v711_v57 }
  0xad   : > { %1450 = vmatprep.subr.msk.bf16.mxu0 %vm224_vm2, %v714_v56  ;;  %v726_v62 = vsel %vm224_vm2, %v715_v58, 0 }
  0xaf   : > { %v834_v61 = vpop.permute.xlu0 %833  ;;  %v836_v63 = vpop.permute.xlu1 %835 }
  0xb0   : > { %v842_v1 = vsel %vm841_vm7, %v834_v61, %v836_v63 }
  0xb1   : > { %1447 = vmatmul.mubr.msk.bf16.vlgmr.msra.gmra.mxu0 %vm220_vm3, %v1445_v59  ;;  %1512 = vmatmul.mubr.msk.bf16.vlgmr.msra.gmra.mxu1 %vm220_vm3, %v1445_v59  ;;  %v849_v8 = vsel %vm224_vm2, %v842_v1, 0 }
  0xb2   : > { %743 = vmatpush1.bf16.msra.mxu0 %v720_v60  ;;  %760 = vmatprep.mubr.bf16.mxu0 %v1697_v6 }
  0xb3   : > { %v838_v0 = vpop.permute.xlu0 %837  ;;  %1516 = vmatpush3.bf16.msra.mxu1 %v726_v62  ;;  %1517 = vmatprep.mubr.msk.bf16.mxu1 %vm1698_vm0, %v1696_v5  ;;  %v840_v3 = vpop.permute.xlu1 %839 }
  0xb4   : > { %v843_v2 = vsel %vm841_vm7, %v836_v63, %v838_v0  ;;  %1521 = vmatprep.subr.bf16.mxu1 %v1696_v5  ;;  %v844_v4 = vsel %vm841_vm7, %v838_v0, %v840_v3 }
  0xb5   : > { %1454 = vmatprep.subr.msk.bf16.mxu0 %vm224_vm2, %v843_v2  ;;  %v855_v10 = vsel %vm224_vm2, %v844_v4, 0 }
  0xb7   : > { %v963_v9 = vpop.permute.xlu0 %962  ;;  %v965_v11 = vpop.permute.xlu1 %964 }
  0xb8   : > { %v971_v13 = vsel %vm970_vm8, %v963_v9, %v965_v11 }
  0xb9   : > { %1451 = vmatmul.mubr.msk.bf16.vlgmr.msra.gmra.mxu0 %vm220_vm3, %v1449_v7  ;;  %1518 = vmatmul.mubr.msk.bf16.vlgmr.msra.gmra.mxu1 %vm220_vm3, %v1449_v7  ;;  %v978_v18 = vsel %vm224_vm2, %v971_v13, 0 }
  0xba   : > { %872 = vmatpush1.bf16.msra.mxu0 %v849_v8  ;;  %889 = vmatprep.mubr.bf16.mxu0 %v1697_v6 }
  0xbb   : > { %v967_v12 = vpop.permute.xlu0 %966  ;;  %1522 = vmatpush3.bf16.msra.mxu1 %v855_v10  ;;  %1523 = vmatprep.mubr.msk.bf16.mxu1 %vm1698_vm0, %v1696_v5  ;;  %v969_v15 = vpop.permute.xlu1 %968 }
  0xbc   : > { %v972_v14 = vsel %vm970_vm8, %v965_v11, %v967_v12  ;;  %1527 = vmatprep.subr.bf16.mxu1 %v1696_v5  ;;  %v973_v16 = vsel %vm970_vm8, %v967_v12, %v969_v15 }
  0xbd   : > { %1458 = vmatprep.subr.msk.bf16.mxu0 %vm224_vm2, %v972_v14  ;;  %v984_v20 = vsel %vm224_vm2, %v973_v16, 0 }
  0xbf   : > { %v1092_v19 = vpop.permute.xlu0 %1091  ;;  %v1094_v21 = vpop.permute.xlu1 %1093 }
  0xc0   : > { %v1100_v23 = vsel %vm1099_vm9, %v1092_v19, %v1094_v21 }
  0xc1   : > { %1455 = vmatmul.mubr.msk.bf16.vlgmr.msra.gmra.mxu0 %vm220_vm3, %v1453_v17  ;;  %1524 = vmatmul.mubr.msk.bf16.vlgmr.msra.gmra.mxu1 %vm220_vm3, %v1453_v17  ;;  %v1107_v28 = vsel %vm224_vm2, %v1100_v23, 0 }
  0xc2   : > { %1001 = vmatpush1.bf16.msra.mxu0 %v978_v18  ;;  %1018 = vmatprep.mubr.bf16.mxu0 %v1697_v6 }
  0xc3   : > { %v1096_v22 = vpop.permute.xlu0 %1095  ;;  %1528 = vmatpush3.bf16.msra.mxu1 %v984_v20  ;;  %1529 = vmatprep.mubr.msk.bf16.mxu1 %vm1698_vm0, %v1696_v5  ;;  %v1098_v25 = vpop.permute.xlu1 %1097 }
  0xc4   : > { %v1101_v24 = vsel %vm1099_vm9, %v1094_v21, %v1096_v22  ;;  %1533 = vmatprep.subr.bf16.mxu1 %v1696_v5  ;;  %v1102_v26 = vsel %vm1099_vm9, %v1096_v22, %v1098_v25 }
  0xc5   : > { %1462 = vmatprep.subr.msk.bf16.mxu0 %vm224_vm2, %v1101_v24  ;;  %v1113_v30 = vsel %vm224_vm2, %v1102_v26, 0 }
  0xc7   : > { %v1221_v29 = vpop.permute.xlu0 %1220  ;;  %v1223_v31 = vpop.permute.xlu1 %1222 }
  0xc8   : > { %v1229_v33 = vsel %vm1228_vm10, %v1221_v29, %v1223_v31 }
  0xc9   : > { %1459 = vmatmul.mubr.msk.bf16.vlgmr.msra.gmra.mxu0 %vm220_vm3, %v1457_v27  ;;  %1530 = vmatmul.mubr.msk.bf16.vlgmr.msra.gmra.mxu1 %vm220_vm3, %v1457_v27  ;;  %v1236_v38 = vsel %vm224_vm2, %v1229_v33, 0 }
  0xca   : > { %1130 = vmatpush1.bf16.msra.mxu0 %v1107_v28  ;;  %1147 = vmatprep.mubr.bf16.mxu0 %v1697_v6 }
  0xcb   : > { %v1225_v32 = vpop.permute.xlu0 %1224  ;;  %1534 = vmatpush3.bf16.msra.mxu1 %v1113_v30  ;;  %1535 = vmatprep.mubr.msk.bf16.mxu1 %vm1698_vm0, %v1696_v5  ;;  %v1227_v35 = vpop.permute.xlu1 %1226 }
  0xcc   : > { %v1230_v34 = vsel %vm1228_vm10, %v1223_v31, %v1225_v32  ;;  %1539 = vmatprep.subr.bf16.mxu1 %v1696_v5  ;;  %v1231_v36 = vsel %vm1228_vm10, %v1225_v32, %v1227_v35 }
  0xcd   : > { %1466 = vmatprep.subr.msk.bf16.mxu0 %vm224_vm2, %v1230_v34  ;;  %v1242_v39 = vsel %vm224_vm2, %v1231_v36, 0 }
  0xd1   : > { %1463 = vmatmul.mubr.msk.bf16.vlgmr.msra.gmra.mxu0 %vm220_vm3, %v1461_v37  ;;  %1536 = vmatmul.mubr.msk.bf16.vlgmr.msra.gmra.mxu1 %vm220_vm3, %v1461_v37 }
  0xd2   : > { %1259 = vmatpush1.bf16.msra.mxu0 %v1236_v38  ;;  %1276 = vmatprep.mubr.bf16.mxu0 %v1697_v6 }
  0xd3   : > { %1540 = vmatpush3.bf16.msra.mxu1 %v1242_v39  ;;  %1541 = vmatprep.mubr.msk.bf16.mxu1 %vm1698_vm0, %v1696_v5 }
  0xd9   : > { %1467 = vmatmul.mubr.msk.bf16.vlgmr.msra.gmra.mxu0 %vm220_vm3, %v1465_v40  ;;  %1542 = vmatmul.mubr.msk.bf16.vlgmr.msra.gmra.mxu1 %vm220_vm3, %v1465_v40 }
 0x159   : > { %v268_v41 = vpop.f32.mrf.mxu0  ;;  %v309_v43 = vpop.f32.mrf.mxu1 }
 0x15b   : > { %v270_v42 = vpop.f32.mrf.mxu0  ;;  %v1495_v45 = vpop.f32.mrf.mxu1 }
 0x15d   : > { %v272_v44 = vpop.f32.mrf.mxu0  ;;  %v312_v46 = vpop.f32.mrf.mxu1 }
 0x15f   : > { %v273_v6 = vpop.f32.mrf.mxu0  ;;  %v1496_v47 = vpop.f32.mrf.mxu1 }
 0x161   : > { %v378_v48 = vpop.f32.mrf.mxu0  ;;  %v419_v50 = vpop.f32.mrf.mxu1 }
 0x162   : > { %v379_v28 = vadd.f32 %v378_v48, %v268_v41  ;;  %v420_v32 = vadd.f32 %v419_v50, %v309_v43 }
 0x163   : > { %v380_v49 = vpop.f32.mrf.mxu0  ;;  %v1501_v51 = vpop.f32.mrf.mxu1 }
 0x164   : > { %v381_v31 = vadd.f32 %v380_v49, %v270_v42 }
 0x165   : > { %v382_v5 = vpop.f32.mrf.mxu0  ;;  %v422_v53 = vpop.f32.mrf.mxu1 }
 0x167   : > { %v383_v52 = vpop.f32.mrf.mxu0  ;;  %v1502_v54 = vpop.f32.mrf.mxu1 }
 0x169   : > { %v504_v55 = vpop.f32.mrf.mxu0  ;;  %v545_v57 = vpop.f32.mrf.mxu1 }
 0x16a   : > { %v551_v33 = vadd.f32 %v504_v55, %v379_v28  ;;  %v553_v37 = vadd.f32 %v545_v57, %v420_v32  ;;  %v1332_v57 = vpop.permute.xlu0 %1331 }
 0x16b   : > { %v506_v56 = vpop.f32.mrf.mxu0  ;;  %v1507_v59 = vpop.f32.mrf.mxu1 }
 0x16c   : > { %v552_v36 = vadd.f32 %v506_v56, %v381_v31 }
 0x16d   : > { %v508_v58 = vpop.f32.mrf.mxu0  ;;  %v548_v61 = vpop.f32.mrf.mxu1 }
 0x16f   : > { %v509_v60 = vpop.f32.mrf.mxu0  ;;  %v1508_v62 = vpop.f32.mrf.mxu1 }
 0x171   : > { %v633_v63 = vpop.f32.mrf.mxu0  ;;  %v674_v1 = vpop.f32.mrf.mxu1 }
 0x172   : > { %v680_v38 = vadd.f32 %v633_v63, %v551_v33  ;;  %v682_v45 = vadd.f32 %v674_v1, %v553_v37 }
 0x173   : > { %v635_v0 = vpop.f32.mrf.mxu0  ;;  %v1513_v3 = vpop.f32.mrf.mxu1 }
 0x174   : > { %v681_v44 = vadd.f32 %v635_v0, %v552_v36 }
 0x175   : > { %v637_v2 = vpop.f32.mrf.mxu0  ;;  %v677_v7 = vpop.f32.mrf.mxu1 }
 0x177   : > { %v638_v4 = vpop.f32.mrf.mxu0  ;;  %v1514_v8 = vpop.f32.mrf.mxu1 }
 0x179   : > { %v762_v9 = vpop.f32.mrf.mxu0  ;;  %v803_v11 = vpop.f32.mrf.mxu1 }
 0x17a   : > { %v809_v6 = vadd.f32 %v762_v9, %v680_v38  ;;  %v811_v48 = vadd.f32 %v803_v11, %v682_v45 }
 0x17b   : > { %v764_v10 = vpop.f32.mrf.mxu0  ;;  %v1519_v13 = vpop.f32.mrf.mxu1 }
 0x17c   : > { %v810_v41 = vadd.f32 %v764_v10, %v681_v44 }
 0x17d   : > { %v766_v12 = vpop.f32.mrf.mxu0  ;;  %v806_v15 = vpop.f32.mrf.mxu1 }
 0x17f   : > { %v767_v14 = vpop.f32.mrf.mxu0  ;;  %v1520_v16 = vpop.f32.mrf.mxu1 }
 0x181   : > { %v891_v17 = vpop.f32.mrf.mxu0  ;;  %v932_v19 = vpop.f32.mrf.mxu1 }
 0x182   : > { %v938_v5 = vadd.f32 %v891_v17, %v809_v6  ;;  %v940_v50 = vadd.f32 %v932_v19, %v811_v48 }
 0x183   : > { %v893_v18 = vpop.f32.mrf.mxu0  ;;  %v1525_v21 = vpop.f32.mrf.mxu1 }
 0x184   : > { %v939_v49 = vadd.f32 %v893_v18, %v810_v41 }
 0x185   : > { %v895_v20 = vpop.f32.mrf.mxu0  ;;  %v935_v23 = vpop.f32.mrf.mxu1 }
 0x187   : > { %v896_v22 = vpop.f32.mrf.mxu0  ;;  %v1526_v24 = vpop.f32.mrf.mxu1 }
 0x189   : > { %v1020_v25 = vpop.f32.mrf.mxu0  ;;  %v1061_v27 = vpop.f32.mrf.mxu1 }
 0x18a   : > { %v1067_v51 = vadd.f32 %v1020_v25, %v938_v5  ;;  %v1069_v55 = vadd.f32 %v1061_v27, %v940_v50 }
 0x18b   : > { %v1022_v26 = vpop.f32.mrf.mxu0  ;;  %v1531_v30 = vpop.f32.mrf.mxu1 }
 0x18c   : > { %v1068_v54 = vadd.f32 %v1022_v26, %v939_v49 }
 0x18d   : > { %v1024_v29 = vpop.f32.mrf.mxu0  ;;  %v1064_v35 = vpop.f32.mrf.mxu1 }
 0x18f   : > { %v1025_v34 = vpop.f32.mrf.mxu0  ;;  %v1532_v39 = vpop.f32.mrf.mxu1 }
 0x191   : > { %v1149_v40 = vpop.f32.mrf.mxu0  ;;  %v1190_v47 = vpop.f32.mrf.mxu1 }
 0x192   : > { %v1196_v56 = vadd.f32 %v1149_v40, %v1067_v51  ;;  %v1198_v61 = vadd.f32 %v1190_v47, %v1069_v55 }
 0x193   : > { %v1151_v46 = vpop.f32.mrf.mxu0  ;;  %v1537_v43 = vpop.f32.mrf.mxu1 }
 0x194   : > { %v1197_v60 = vadd.f32 %v1151_v46, %v1068_v54 }
 0x195   : > { %v1153_v42 = vpop.f32.mrf.mxu0  ;;  %v1193_v53 = vpop.f32.mrf.mxu1 }
 0x197   : > { %v1154_v52 = vpop.f32.mrf.mxu0  ;;  %v1538_v58 = vpop.f32.mrf.mxu1 }
 0x199   : > { %v1278_v59 = vpop.f32.mrf.mxu0  ;;  %v1319_v0 = vpop.f32.mrf.mxu1 }
 0x19a   : > { %v1325_v62 = vadd.f32 %v1278_v59, %v1196_v56  ;;  %v1327_v3 = vadd.f32 %v1319_v0, %v1198_v61 }
 0x19b   : > { %v1280_v63 = vpop.f32.mrf.mxu0  ;;  %v1543_v7 = vpop.f32.mrf.mxu1 }
 0x19c   : > { %v1334_v1 = vadd.f32 %v1332_v57, %v1325_v62  ;;  %v1326_v2 = vadd.f32 %v1280_v63, %v1197_v60  ;;  %v1336_v9 = vadd.f32 %v1332_v57, %v1327_v3 }
 0x19d   : > { %v1282_v4 = vpop.f32.mrf.mxu0  ;;  %v1322_v11 = vpop.f32.mrf.mxu1 }
 0x19e   : > { %1337 = vst [vmem:[%s177_s28] sm:$0xff] %v1334_v1  ;;  %v1335_v8 = vadd.f32 %v1332_v57, %v1326_v2  ;;  %1339 = vst [vmem:[%s177_s28 + $0x10] sm:$0xff] %v1336_v9 }
 0x19f   : > { %v1283_v10 = vpop.f32.mrf.mxu0  ;;  %v1544_v12 = vpop.f32.mrf.mxu1 }
 0x1a0   : > { %1338 = vst [vmem:[%s177_s28 + $0x8] sm:$0xff] %v1335_v8 }
 0x1a1   : > { %1630 = shalt.err (!%p1627_p5)
}
 0x1a2   : > { %s1631_s10 = scalar_lea.hbm %s1915_s5, 384  ;;  %s1635_s19 = scalar_lea.hbm %s1966_s3, 768 }
 0x1a3   : > { %p1632_p6 = scmp.ne.s32.totalorder %s1915_s5, %s1631_s10  ;;  %p1636_p10 = scmp.lt.s32.totalorder %s1915_s5, %s1966_s3 }
 0x1a4   : > { %p1637_p11 = scmp.lt.s32.totalorder %s1635_s19, %s1631_s10 }
 0x1a5   : > { %p1633_p7 = pnand %p1632_p6, %p1768_p4 }
 0x1a6   : > { %p1638_p12 = por %p1637_p11, %p1636_p10 }
 0x1a7   : > { %p1634_p9 = pneg %p1633_p7 }
 0x1a9   : > { %p1639_p13 = pnand %p1638_p12, %p1634_p9 }
 0x1ab   : > { %1642 = shalt.err (!%p1639_p13)
}
 0x1ac   : > { %1547 = dma.vmem_to_hbm [thread:$0]  (%p1768_p4), %s1917_s29, 384, %s1915_s5, %s1341_s15  }
 0x1ad PF: > { %p1553_p0 = scmp.ge.s32.totalorder %s1693_s17, 2  ;;  %s1369_s26 = sand.u32 1, %s1673_s12  }
 0x1ae   : > { %s1370_s27 = scalar_lea.sflag [#allocation3], %s1369_s26 }
 0x1af   : > { %p1550_p1 = pnand %p1553_p0, %p1775_p8 }
 0x1b1   : > { %p1551_p2 = pneg %p1550_p1 }
 0x1b3   : > { %1668 = dma.done.wait (%p1551_p2), %s1370_s27, 384  }
 0x1b4   : > { %1670 = vsyncadd (%p1551_p2), %s1370_s27, 4294966912  ;;  %s16_s17 = sadd.s32 1, %s1693_s17   ;;  %s1969_s12 = smov %s1677_s13 }
 0x1b5   : > { %p13_p3 = scmp.ge.s32.totalorder %s16_s17, 4   ;;  %s1970_s13 = smov %s1681_s14 }
 0x1b6   : > { %s1971_s14 = smov %s1781_s25  ;;  %s1972_s15 = smov %s1689_s16 }
 0x1b7   : > { %s1973_s16 = smov %s1975_s20  ;;  %15 = sbr.rel (!%p13_p3) target bundleno = 4 (0x4), region = 75 }
 0x1bc   :  { %1375 = vsyncpa [#allocation3], 1 }
 0x1bd   :  { %1377 = vsyncpa [#allocation3 + $0x1], 1 }

</bundles_post_ra>
